<compile_context>
chip_gen: v7x
topology: tpu7x:2x2x1
jax: 0.10.0
libtpu: 0.0.40
codegen_flags: <defaults>
</compile_context>

<pallas_src>
import jax
import jax.numpy as jnp
from jax.experimental import pallas as pl
from jax.experimental.pallas import tpu as pltpu


def _cdiv(a, b):
    return (a + b - 1) // b


def _round_up(v, m):
    return _cdiv(v, m) * m


def _vmem_budget_bytes():
    """~75% of physical VMEM (96 MiB on v5e/v6e, 48 MiB on v7x)."""
    cap = 128 * 1024 * 1024
    try:
        info = pltpu.get_tpu_info()
        cap = int(getattr(info, "vmem_capacity_bytes", cap))
    except Exception:
        pass
    return int((cap // 4) * 3)


def _vmem_footprint(tm, tn, tk, in_item, out_item):
    # Double-buffered input/output tiles + resident f32 accumulator + scales.
    x_buf = tm * tk * in_item
    y_buf = tk * tn * in_item
    o_buf = tm * tn * out_item
    scales = (tm + tn) * 4
    acc = tm * tn * 4
    return 2 * (x_buf + y_buf + o_buf + scales) + acc


def _similarity_kernel(x_ref, yT_ref, inv_x_ref, inv_y_ref, o_ref, acc_ref):
    """One (tm, tn) output tile; the k grid axis accumulates over the hidden dim."""
    k = pl.program_id(2)

    @pl.when(k == 0)
    def _():
        acc_ref[...] = jnp.zeros_like(acc_ref)

    # MXU matmul in the inputs' native dtype, f32 accumulation.
    acc_ref[...] += jnp.dot(x_ref[...], yT_ref[...],
                            preferred_element_type=jnp.float32)

    @pl.when(k == pl.num_programs(2) - 1)
    def _():
        # Rank-1 scaling with 1/temp already folded into the row scale.
        o_ref[...] = (acc_ref[...] * inv_x_ref[...] * inv_y_ref[...]).astype(o_ref.dtype)


def similarity(x, y, temp, eps=1e-8, tm=512, tn=512,
               matmul_dtype=None, out_dtype=jnp.float32):
    """SimCSE Similarity forward.

    x: (B, 1, H), y: (1, B, H) -> (B, By) cosine-sim / temp
    (also accepts already-squeezed (B, H) / (By, H) inputs).
    """
    x2d = x.reshape(x.shape[0], x.shape[-1]) if x.ndim == 3 else x
    y2d = y.reshape(y.shape[1], y.shape[-1]) if y.ndim == 3 else y
    B, H = x2d.shape
    By = y2d.shape[0]

    mm_dtype = x2d.dtype if matmul_dtype is None else jnp.dtype(matmul_dtype)
    in_item = jnp.dtype(mm_dtype).itemsize
    out_item = jnp.dtype(out_dtype).itemsize
    # Sublane packing multiple of the matmul dtype (8 f32 / 16 bf16 / 32 i8).
    sublane_mult = max(8, 32 // in_item)

    # --- Tile selection (balanced so padding waste stays small) ------------
    grid_i0 = max(1, _cdiv(B, tm))
    tm = min(tm, _round_up(_cdiv(B, grid_i0), sublane_mult))
    grid_j0 = max(1, _cdiv(By, tn))
    tn = min(tn, _round_up(_cdiv(By, grid_j0), 128))

    # v7x has 2 TensorCores: keep >= 2 tiles along one "parallel" axis.
    Byr = _round_up(By, 128)
    if _cdiv(B, tm) < 2 and _cdiv(By, tn) < 2 and Byr >= 2 * 128:
        tn = _round_up(_cdiv(Byr, 2), 128)

    # Hidden-dim tile; shrink until the double-buffered footprint fits VMEM.
    budget = _vmem_budget_bytes()
    tk = _round_up(H, 128)
    while _vmem_footprint(tm, tn, tk, in_item, out_item) > budget and tk > 128:
        tk = _round_up(tk // 2, 128)
    while _vmem_footprint(tm, tn, tk, in_item, out_item) > budget and tn > 128:
        tn = _round_up(tn // 2, 128)
    while _vmem_footprint(tm, tn, tk, in_item, out_item) > budget and tm > sublane_mult:
        tm = _round_up(tm // 2, sublane_mult)

    Bp = _round_up(B, tm)
    Byp = _round_up(By, tn)
    Hp = _round_up(H, tk)

    # --- Hoisted inverse norms (tiny side inputs), 1/temp folded in --------
    # TODO(synk): this clamps each norm at eps separately
    # (max(||x||,eps)*max(||y||,eps)) instead of PyTorch's max(||x||*||y||, eps);
    # results differ only for near-zero embeddings.
    inv_temp = 1.0 / float(temp)
    eps2 = float(eps) * float(eps)
    xf = x2d.astype(jnp.float32)
    yf = y2d.astype(jnp.float32)
    inv_x = inv_temp * jax.lax.rsqrt(
        jnp.maximum(jnp.sum(xf * xf, axis=-1, keepdims=True), eps2))      # (B, 1)
    inv_y = jax.lax.rsqrt(
        jnp.maximum(jnp.sum(yf * yf, axis=-1, keepdims=True), eps2)).T    # (1, By)

    # Zero-padding is exact: padded rows/cols give 0 dot products and get
    # multiplied by 0 scales, then cropped from the output.
    x_in = x2d.astype(mm_dtype)
    yT_in = y2d.astype(mm_dtype).T        # one wrapper-side transpose, (H, By)
    if (Bp, Hp) != (B, H):
        x_in = jnp.pad(x_in, ((0, Bp - B), (0, Hp - H)))
    if (Hp, Byp) != (H, By):
        yT_in = jnp.pad(yT_in, ((0, Hp - H), (0, Byp - By)))
    if Bp != B:
        inv_x = jnp.pad(inv_x, ((0, Bp - B), (0, 0)))
    if Byp != By:
        inv_y = jnp.pad(inv_y, ((0, 0), (0, Byp - By)))

    grid = (Bp // tm, Byp // tn, Hp // tk)

    # Actual traffic: x re-streamed grid_j times, y re-streamed grid_i times.
    cost = pl.CostEstimate(
        flops=2 * Bp * Byp * Hp,
        transcendentals=0,
        bytes_accessed=(int(x_in.size) * in_item * grid[1]
                        + int(yT_in.size) * in_item * grid[0]
                        + int(inv_x.size) * 4 * grid[1]
                        + int(inv_y.size) * 4 * grid[0]
                        + Bp * Byp * out_item))

    out = pl.pallas_call(
        _similarity_kernel,
        out_shape=jax.ShapeDtypeStruct((Bp, Byp), out_dtype),
        grid_spec=pltpu.PrefetchScalarGridSpec(
            num_scalar_prefetch=0,
            grid=grid,
            in_specs=[
                pl.BlockSpec((tm, tk), lambda i, j, k: (i, k)),
                pl.BlockSpec((tk, tn), lambda i, j, k: (k, j)),
                pl.BlockSpec((tm, 1), lambda i, j, k: (i, 0)),
                pl.BlockSpec((1, tn), lambda i, j, k: (0, j)),
            ],
            out_specs=pl.BlockSpec((tm, tn), lambda i, j, k: (i, j)),
            scratch_shapes=[pltpu.VMEM((tm, tn), jnp.float32)],
        ),
        compiler_params=pltpu.CompilerParams(
            dimension_semantics=("parallel", "parallel", "arbitrary"),
            vmem_limit_bytes=budget,
        ),
        cost_estimate=cost,
    )(x_in, yT_in, inv_x, inv_y)

    if (Bp, Byp) != (B, By):
        out = out[:B, :By]
    return out


def _reference(x, y, temp, eps=1e-8):
    B, H = x.shape[0], x.shape[-1]
    By = y.shape[1]
    dots = jnp.einsum("aih,jbh->ab", x, y)
    nx = jnp.linalg.norm(x.reshape(B, H), axis=-1, keepdims=True)
    ny = jnp.linalg.norm(y.reshape(By, H), axis=-1, keepdims=True)
    return dots / jnp.maximum(nx * ny.T, eps) / temp


if __name__ == "__main__":
    temp = 0.05  # SimCSE default temperature
    key = jax.random.PRNGKey(0)
    kx, ky, kx2, ky2 = jax.random.split(key, 4)

    # 1) Small shape consistent with the module's SimCSE usage.
    B, H = 8, 32
    x = jax.random.normal(kx, (B, 1, H), dtype=jnp.float32)
    y = jax.random.normal(ky, (1, B, H), dtype=jnp.float32)
    out = jax.block_until_ready(similarity(x, y, temp))
    ref = _reference(x, y, temp)
    assert out.shape == (B, B)
    assert jnp.allclose(out, ref, atol=1e-4, rtol=1e-4)

    # 2) Non-aligned shape exercising multi-tile grid, padding and crop.
    B2, H2 = 200, 160
    x2 = jax.random.normal(kx2, (B2, 1, H2), dtype=jnp.float32)
    y2 = jax.random.normal(ky2, (1, B2, H2), dtype=jnp.float32)
    out2 = jax.block_until_ready(similarity(x2, y2, temp))
    ref2 = _reference(x2, y2, temp)
    assert out2.shape == (B2, B2)
    assert jnp.allclose(out2, ref2, atol=1e-3, rtol=1e-4)

    print("KERNEL_OK")
</pallas_src>

<mosaic_0001>
module attributes {stable_mosaic.version = 11 : i64} {
  func.func @_similarity_kernel(%arg0: i32, %arg1: i32, %arg2: i32, %arg3: memref<8x128xf32, #tpu.memory_space<vmem>>, %arg4: memref<128x128xf32, #tpu.memory_space<vmem>>, %arg5: memref<8x1xf32, #tpu.memory_space<vmem>>, %arg6: memref<1x128xf32, #tpu.memory_space<vmem>>, %arg7: memref<8x128xf32, #tpu.memory_space<vmem>>, %arg8: memref<8x128xf32, #tpu.memory_space<vmem>>) attributes {dimension_semantics = [#tpu.dimension_semantics<parallel>, #tpu.dimension_semantics<parallel>, #tpu.dimension_semantics<arbitrary>], iteration_bounds = array<i64: 1, 1, 1>, scalar_prefetch = 0 : i64, scratch_operands = 1 : i64, tpu.core_type = #tpu.core_type<tc>, window_params = [{transform_indices = @transform_0, window_bounds = array<i64: 8, 128>}, {transform_indices = @transform_1, window_bounds = array<i64: 128, 128>}, {transform_indices = @transform_2, window_bounds = array<i64: 8, 1>}, {transform_indices = @transform_3, window_bounds = array<i64: 1, 128>}, {transform_indices = @transform_4, window_bounds = array<i64: 8, 128>}]} {
    %c0_i32 = arith.constant 0 : i32
    %0 = arith.cmpi eq, %arg2, %c0_i32 : i32
    %1 = arith.extui %0 : i1 to i32
    %c0_i32_0 = arith.constant 0 : i32
    %2 = arith.cmpi ne, %1, %c0_i32_0 : i32
    scf.if %2 {
      %cst_10 = arith.constant 0.000000e+00 : f32
      %12 = vector.broadcast %cst_10 : f32 to vector<8x128xf32>
      %c0_11 = arith.constant 0 : index
      %c0_12 = arith.constant 0 : index
      %13 = vector.load %arg8[%c0_11, %c0_12] : memref<8x128xf32, #tpu.memory_space<vmem>>, vector<8x128xf32>
      tpu.vector_store %arg8[%c0_11, %c0_12], %12 {strides = array<i32>} : memref<8x128xf32, #tpu.memory_space<vmem>>, vector<8x128xf32>,
    } else {
    }
    %c0 = arith.constant 0 : index
    %c0_1 = arith.constant 0 : index
    %3 = vector.load %arg8[%c0, %c0_1] : memref<8x128xf32, #tpu.memory_space<vmem>>, vector<8x128xf32>
    %c0_2 = arith.constant 0 : index
    %c0_3 = arith.constant 0 : index
    %4 = vector.load %arg3[%c0_2, %c0_3] : memref<8x128xf32, #tpu.memory_space<vmem>>, vector<8x128xf32>
    %c0_4 = arith.constant 0 : index
    %c0_5 = arith.constant 0 : index
    %5 = vector.load %arg4[%c0_4, %c0_5] : memref<128x128xf32, #tpu.memory_space<vmem>>, vector<128x128xf32>
    %cst = arith.constant dense<0.000000e+00> : vector<8x128xf32>
    %6 = tpu.matmul %4, %5, %cst {dimension_numbers = #tpu.dot_dimension_numbers<[1], [0], [0], [1], [0, 0, 1, 1], [], []>} : vector<8x128xf32>, vector<128x128xf32>, vector<8x128xf32> -> vector<8x128xf32>
    %7 = arith.addf %3, %6 : vector<8x128xf32>
    %c0_6 = arith.constant 0 : index
    %c0_7 = arith.constant 0 : index
    %8 = vector.load %arg8[%c0_6, %c0_7] : memref<8x128xf32, #tpu.memory_space<vmem>>, vector<8x128xf32>
    tpu.vector_store %arg8[%c0_6, %c0_7], %7 {strides = array<i32>} : memref<8x128xf32, #tpu.memory_space<vmem>>, vector<8x128xf32>,
    %c0_i32_8 = arith.constant 0 : i32
    %9 = arith.cmpi eq, %arg2, %c0_i32_8 : i32
    %10 = arith.extui %9 : i1 to i32
    %c0_i32_9 = arith.constant 0 : i32
    %11 = arith.cmpi ne, %10, %c0_i32_9 : i32
    scf.if %11 {
      %c0_10 = arith.constant 0 : index
      %c0_11 = arith.constant 0 : index
      %12 = vector.load %arg8[%c0_10, %c0_11] : memref<8x128xf32, #tpu.memory_space<vmem>>, vector<8x128xf32>
      %c0_12 = arith.constant 0 : index
      %c0_13 = arith.constant 0 : index
      %13 = vector.load %arg5[%c0_12, %c0_13] : memref<8x1xf32, #tpu.memory_space<vmem>>, vector<8x1xf32>
      %14 = vector.broadcast %13 : vector<8x1xf32> to vector<8x128xf32>
      %15 = arith.mulf %12, %14 : vector<8x128xf32>
      %c0_14 = arith.constant 0 : index
      %c0_15 = arith.constant 0 : index
      %16 = vector.load %arg6[%c0_14, %c0_15] : memref<1x128xf32, #tpu.memory_space<vmem>>, vector<1x128xf32>
      %17 = vector.broadcast %16 : vector<1x128xf32> to vector<8x128xf32>
      %18 = arith.mulf %15, %17 : vector<8x128xf32>
      %c0_16 = arith.constant 0 : index
      %c0_17 = arith.constant 0 : index
      %19 = vector.load %arg7[%c0_16, %c0_17] : memref<8x128xf32, #tpu.memory_space<vmem>>, vector<8x128xf32>
      tpu.vector_store %arg7[%c0_16, %c0_17], %18 {strides = array<i32>} : memref<8x128xf32, #tpu.memory_space<vmem>>, vector<8x128xf32>,
    } else {
    }
    return
  }
  func.func @transform_0(%arg0: i32, %arg1: i32, %arg2: i32) -> (i32, i32) {
    %c0_i32 = arith.constant 0 : i32
    return %arg0, %arg2 : i32, i32
  }
  func.func @transform_1(%arg0: i32, %arg1: i32, %arg2: i32) -> (i32, i32) {
    %c0_i32 = arith.constant 0 : i32
    return %arg2, %arg1 : i32, i32
  }
  func.func @transform_2(%arg0: i32, %arg1: i32, %arg2: i32) -> (i32, i32) {
    %c0_i32 = arith.constant 0 : i32
    %c0_i32_0 = arith.constant 0 : i32
    return %arg0, %c0_i32 : i32, i32
  }
  func.func @transform_3(%arg0: i32, %arg1: i32, %arg2: i32) -> (i32, i32) {
    %c0_i32 = arith.constant 0 : i32
    %c0_i32_0 = arith.constant 0 : i32
    return %c0_i32, %arg1 : i32, i32
  }
  func.func @transform_4(%arg0: i32, %arg1: i32, %arg2: i32) -> (i32, i32) {
    %c0_i32 = arith.constant 0 : i32
    return %arg0, %arg1 : i32, i32
  }
}

</mosaic_0001>

<bundles_post_ra>
// kernel: tpu_custom_call.1
= control target key start
LH: loop header
LB: loop body
LE: loop exit
PB: predicated region body
PF: predicated region fallthrough
CT: control target
= control target key end

     0   :  { %9 = vsyncpa [#allocation4], 0  ;;  %s502_s0 = inlined_call_operand.hbm [shape: f32[8,128], index: 0, kind: input, shape index: {}]   ;;  %s503_s1 = inlined_call_operand.hbm [shape: f32[128,128], index: 1, kind: input, shape index: {}]   ;;  %s504_s2 = inlined_call_operand.hbm [shape: f32[8,1], index: 2, kind: input, shape index: {}]   ;;  %s505_s3 = inlined_call_operand.hbm [shape: f32[1,128], index: 3, kind: input, shape index: {}]   ;;  %s506_s4 = inlined_call_operand.hbm [shape: f32[8,128], index: 4, kind: output, shape index: {}]  }
   0x1   :  { %10 = vsyncpa [#allocation7], 0 }
   0x2   :  { %11 = vsyncpa [#allocation10], 0 }
   0x3   :  { %12 = vsyncpa [#allocation5], 0  ;;  %s406_s15 = smov [#allocation6]   ;;  %s288_s19 = scalar_lea.hbm %s503_s1, 2048 }
   0x4   :  { %s28_s16 = sshll.u32 %s406_s15, 4  ;;  %p289_p0 = scmp.ne.s32.totalorder %s503_s1, %s288_s19  ;;  %s29_s16 = int_to_ptr.vmem [resolvable:$true] %s28_s16 }
   0x5   :  { %p292_p1 = scmp.lt.u32.totalorder %s288_s19, %s503_s1 }
   0x7   :  { %p294_p2 = pnand %p292_p1, %p289_p0 }
   0x9   :  { %297 = shalt.err (!%p294_p2)
}
   0xa   :  { %s298_s24 = scalar_lea.vmem %s29_s16, 2048  ;;  %p303_p4 = scmp.lt.s32.totalorder %s29_s16, %s29_s16 }
   0xb   :  { %p299_p3 = scmp.ne.s32.totalorder %s29_s16, %s298_s24  ;;  %p304_p5 = scmp.lt.s32.totalorder %s298_s24, %s298_s24 }
   0xd   :  { %p305_p6 = por %p304_p5, %p303_p4 }
   0xf   :  { %p306_p7 = pnand %p305_p6, %p299_p3 }
  0x11   :  { %309 = shalt.err (!%p306_p7)
}
  0x12   :  { %s407_s25 = smov 128   ;;  %s408_s26 = smov 8  }
  0x13   :  { %34 = dma.hbm_to_vmem [thread:$0]  %s503_s1, 2048, %s29_s16, [#allocation7], %s407_s25, %s407_s25, %s408_s26  }
  0x14   :  { %s409_s29 = smov [#allocation3]   ;;  %s410_s5 = smov [#allocation8]  }
  0x15   :  { %s19_s30 = sshll.u32 %s409_s29, 4  ;;  %s41_s6 = sshll.u32 %s410_s5, 4  ;;  %s20_s30 = int_to_ptr.vmem [resolvable:$true] %s19_s30  ;;  %s42_s6 = int_to_ptr.vmem [resolvable:$true] %s41_s6 }
  0x16   :  { %s310_s9 = scalar_lea.hbm %s502_s0, 128 }
  0x17   :  { %p311_p8 = scmp.ne.s32.totalorder %s502_s0, %s310_s9  ;;  %p314_p9 = scmp.lt.u32.totalorder %s310_s9, %s502_s0 }
  0x19   :  { %p316_p10 = pnand %p314_p9, %p311_p8 }
  0x1b   :  { %319 = shalt.err (!%p316_p10)
}
  0x1c   :  { %s320_s1 = scalar_lea.vmem %s20_s30, 128  ;;  %p325_p12 = scmp.lt.s32.totalorder %s20_s30, %s20_s30 }
  0x1d   :  { %p321_p11 = scmp.ne.s32.totalorder %s20_s30, %s320_s1  ;;  %p326_p13 = scmp.lt.s32.totalorder %s320_s1, %s320_s1 }
  0x1f   :  { %p327_p0 = por %p326_p13, %p325_p12 }
  0x21   :  { %p328_p1 = pnand %p327_p0, %p321_p11 }
  0x23   :  { %331 = shalt.err (!%p328_p1)
}
  0x24   :  { %22 = dma.hbm_to_vmem [thread:$0]  %s502_s0, 128, %s20_s30, [#allocation4]  }
  0x25   :  { %s332_s18 = scalar_lea.hbm %s504_s2, 128 }
  0x26   :  { %p333_p2 = scmp.ne.s32.totalorder %s504_s2, %s332_s18  ;;  %p336_p3 = scmp.lt.u32.totalorder %s332_s18, %s504_s2 }
  0x28   :  { %p338_p4 = pnand %p336_p3, %p333_p2 }
  0x2a   :  { %341 = shalt.err (!%p338_p4)
}
  0x2b   :  { %s342_s23 = scalar_lea.vmem %s42_s6, 128  ;;  %p347_p6 = scmp.lt.s32.totalorder %s42_s6, %s42_s6 }
  0x2c   :  { %p343_p5 = scmp.ne.s32.totalorder %s42_s6, %s342_s23  ;;  %p348_p7 = scmp.lt.s32.totalorder %s342_s23, %s342_s23 }
  0x2e   :  { %p349_p8 = por %p348_p7, %p347_p6 }
  0x30   :  { %p350_p9 = pnand %p349_p8, %p343_p5 }
  0x32   :  { %353 = shalt.err (!%p350_p9)
}
  0x33   :  { %44 = dma.hbm_to_vmem [thread:$0]  %s504_s2, 128, %s42_s6, [#allocation7]  }
  0x34   :  { %s411_s25 = smov [#allocation9]   ;;  %s354_s29 = scalar_lea.hbm %s505_s3, 16 }
  0x35   :  { %s51_s26 = sshll.u32 %s411_s25, 4  ;;  %p355_p10 = scmp.ne.s32.totalorder %s505_s3, %s354_s29  ;;  %s52_s26 = int_to_ptr.vmem [resolvable:$true] %s51_s26 }
  0x36   :  { %p358_p11 = scmp.lt.u32.totalorder %s354_s29, %s505_s3 }
  0x38   :  { %p360_p12 = pnand %p358_p11, %p355_p10 }
  0x3a   :  { %363 = shalt.err (!%p360_p12)
}
  0x3b   :  { %s364_s9 = scalar_lea.vmem %s52_s26, 16  ;;  %s368_s2 = scalar_lea.vmem %s52_s26, 32 }
  0x3c   :  { %p365_p13 = scmp.ne.s32.totalorder %s52_s26, %s364_s9  ;;  %p369_p0 = scmp.lt.s32.totalorder %s52_s26, %s52_s26 }
  0x3d   :  { %p370_p1 = scmp.lt.s32.totalorder %s368_s2, %s364_s9 }
  0x3f   :  { %p371_p2 = por %p370_p1, %p369_p0 }
  0x41   :  { %p372_p3 = pnand %p371_p2, %p365_p13 }
  0x43   :  { %375 = shalt.err (!%p372_p3)
}
  0x44   :  { %54 = dma.hbm_to_vmem [thread:$0]  %s505_s3, 16, %s52_s26, [#allocation10]  }
  0x45   :  { %398 = dma.done.wait [#allocation4], 128  }
  0x46   :  { %399 = vsyncadd [#allocation4], 4294967168 }
  0x47   :  { %400 = dma.done.wait [#allocation7], 2176  }
  0x48   :  { %401 = vsyncadd [#allocation7], 4294965120 }
  0x49   :  { %402 = dma.done.wait [#allocation10], 16  }
  0x4a   :  { %403 = vsyncadd [#allocation10], 4294967280  ;;  %v412_v0 = vmov 0.0|0.0   ;;  %vm413_vm0 = vmmov 0   ;;  %v414_v1 = vmov 0.0   ;;  %v415_v2 = vmov 0  }
  0x4b   :  { %252 = vmatprep.subr.bf16.mxu0 %v412_v0  ;;  %249 = vmatprep.mubr.msk.f32.mxu0 %vm413_vm0, %v414_v1  ;;  %v74_v3 = vld [vmem:[#allocation6] sm:$0xff]  ;;  %v75_v4 = vld [vmem:[#allocation6 + $0x8] sm:$0xff]  ;;  %v76_v5 = vld [vmem:[#allocation6 + $0x10] sm:$0xff]  ;;  %s416_s3 = smov [#allocation11]  }
  0x4c   :  { %287 = vset.pattern.permute.xlu0 %v415_v2  ;;  %v253_v6 = vpack.c.bf16 %v75_v4, %v74_v3  ;;  %v77_v7 = vld [vmem:[#allocation6 + $0x18] sm:$0xff]  ;;  %v78_v9 = vld [vmem:[#allocation6 + $0x20] sm:$0xff]  ;;  %v79_v10 = vld [vmem:[#allocation6 + $0x28] sm:$0xff]  ;;  %s188_s11 = sshll.u32 %s416_s3, 4  ;;  %s189_s11 = int_to_ptr.vmem [resolvable:$true] %s188_s11 }
  0x4d   :  { %v256_v8 = vpack.c.bf16 %v77_v7, %v76_v5  ;;  %v166_v11 = vld [vmem:[#allocation8] sm:$0xff]  ;;  %v259_v12 = vpack.c.bf16 %v79_v10, %v78_v9  ;;  %v80_v13 = vld [vmem:[#allocation6 + $0x30] sm:$0xff]  ;;  %v81_v14 = vld [vmem:[#allocation6 + $0x38] sm:$0xff]  ;;  %s376_s12 = scalar_lea.vmem %s189_s11, 128  ;;  %p381_p5 = scmp.lt.s32.totalorder %s189_s11, %s189_s11 }
  0x4e   :  { %254 = vmatpush3.bf16.msra.mxu0 %v253_v6  ;;  %169 = vperm.xlu0 %287, %v166_v11   ;;  %v262_v15 = vpack.c.bf16 %v81_v14, %v80_v13  ;;  %v82_v16 = vld [vmem:[#allocation6 + $0x40] sm:$0xff]  ;;  %v83_v17 = vld [vmem:[#allocation6 + $0x48] sm:$0xff]  ;;  %v84_v19 = vld [vmem:[#allocation6 + $0x50] sm:$0xff]  ;;  %p377_p4 = scmp.ne.s32.totalorder %s189_s11, %s376_s12  ;;  %p382_p6 = scmp.lt.s32.totalorder %s376_s12, %s376_s12 }
  0x4f   :  { %255 = vmatprep.subr.bf16.mxu0 %v412_v0  ;;  %v265_v18 = vpack.c.bf16 %v83_v17, %v82_v16  ;;  %v85_v20 = vld [vmem:[#allocation6 + $0x58] sm:$0xff]  ;;  %v86_v22 = vld [vmem:[#allocation6 + $0x60] sm:$0xff]  ;;  %v87_v23 = vld [vmem:[#allocation6 + $0x68] sm:$0xff] }
  0x50   :  { %v268_v21 = vpack.c.bf16 %v85_v20, %v84_v19  ;;  %v271_v24 = vpack.c.bf16 %v87_v23, %v86_v22  ;;  %v88_v25 = vld [vmem:[#allocation6 + $0x70] sm:$0xff]  ;;  %v89_v26 = vld [vmem:[#allocation6 + $0x78] sm:$0xff]  ;;  %v199_v31 = vld [vmem:[#allocation9] ss:$0 sm:$0xff]  ;;  %p383_p7 = por %p382_p6, %p381_p5 }
  0x51   :  { %v274_v27 = vpack.c.bf16 %v89_v26, %v88_v25  ;;  %v73_v28 = vld [vmem:[#allocation3] sm:$0xff] }
  0x52   :  { %257 = vmatpush3.bf16.msra.mxu0 %v256_v8  ;;  %p384_p8 = pnand %p383_p7, %p377_p4 }
  0x53   :  { %258 = vmatprep.subr.bf16.mxu0 %v412_v0 }
  0x56   :  { %260 = vmatpush3.bf16.msra.mxu0 %v259_v12 }
  0x57   :  { %261 = vmatprep.subr.bf16.mxu0 %v412_v0 }
  0x5a   :  { %263 = vmatpush3.bf16.msra.mxu0 %v262_v15 }
  0x5b   :  { %264 = vmatprep.subr.bf16.mxu0 %v412_v0 }
  0x5e   :  { %266 = vmatpush3.bf16.msra.mxu0 %v265_v18 }
  0x5f   :  { %267 = vmatprep.subr.bf16.mxu0 %v412_v0 }
  0x62   :  { %269 = vmatpush3.bf16.msra.mxu0 %v268_v21 }
  0x63   :  { %270 = vmatprep.subr.bf16.mxu0 %v412_v0 }
  0x66   :  { %272 = vmatpush3.bf16.msra.mxu0 %v271_v24 }
  0x67   :  { %273 = vmatprep.subr.bf16.mxu0 %v412_v0 }
  0x6a   :  { %275 = vmatpush3.bf16.msra.mxu0 %v274_v27 }
  0x6d   :  { %250 = vmatmul.mubr.f32.vlgmr.msra.gmra.mrb[0].mxu0 %v73_v28 }
  0xcd   :  { %v170_v29 = vpop.permute.xlu0 %169 }
 0x140   :  { %v156_v30 = vpop.f32.mrb[0].mxu0 }
 0x141   :  { %v172_v32 = vmul.f32 %v170_v29, %v156_v30  ;;  %v251_v33 = vpop.f32.mrb[1].mxu0 }
 0x143   :  { %v180_v34 = vmul.f32 %v199_v31, %v172_v32 }
 0x145   :  { %181 = vst [vmem:[#allocation11] sm:$0xff] %v180_v34 }
 0x146   :  { %387 = shalt.err (!%p384_p8)
}
 0x147   :  { %s388_s14 = scalar_lea.hbm %s506_s4, 128 }
 0x148   :  { %p389_p9 = scmp.ne.s32.totalorder %s506_s4, %s388_s14  ;;  %p392_p10 = scmp.lt.u32.totalorder %s388_s14, %s506_s4 }
 0x14a   :  { %p394_p11 = pnand %p392_p10, %p389_p9 }
 0x14c   :  { %397 = shalt.err (!%p394_p11)
}
 0x14d   :  { %191 = dma.vmem_to_hbm [thread:$0]  %s189_s11, 128, %s506_s4, [#allocation5]  }
 0x14e   :  { %404 = dma.done.wait [#allocation5], 128  }
 0x14f   :  { %405 = vsyncadd [#allocation5], 4294967168 }
 0x150   :  { %195 = vsyncpa [#allocation4], 1 }
 0x151   :  { %196 = vsyncpa [#allocation7], 1 }
 0x152   :  { %197 = vsyncpa [#allocation10], 1 }
 0x153   :  { %198 = vsyncpa [#allocation5], 1 }

</bundles_post_ra>
